<compile_context>
chip_gen: v7x
topology: tpu7x:2x2x1
jax: 0.10.0
libtpu: 0.0.40
codegen_flags: <defaults>
</compile_context>

<pallas_src>
import functools

import jax
import jax.numpy as jnp
import numpy as np
from jax.experimental import pallas as pl
from jax.experimental.pallas import tpu as pltpu

IN_FEATURES = 4096
OUT_FEATURES = 4


def mlp_kernel(x_ref, w_ref, b_ref, out_ref):
    """One batch tile: matmul + bias + softmax, single merged store.

    x_ref:  (TB, 4096)   w_ref: (4, 4096)   b_ref: (1, 4)
    out_ref: (TB, 8)  -- columns 0:4 = logits, 4:8 = probs
    """
    x = x_ref[...]
    w = w_ref[...]
    # Contract x's dim 1 against w's dim 1 == x @ w.T on the MXU, fp32 acc,
    # without transposing the (4, 4096) weight into a lane-sparse tile.
    logits = jax.lax.dot_general(
        x, w,
        dimension_numbers=(((1,), (1,)), ((), ())),
        preferred_element_type=jnp.float32,
    ) + b_ref[...]  # (TB, 4) + (1, 4) broadcast

    # Softmax over the 4 classes, max-subtracted, computed on fp32 logits.
    m = jnp.max(logits, axis=1, keepdims=True)
    e = jnp.exp(logits - m)
    probs = e / jnp.sum(e, axis=1, keepdims=True)

    out_ref[...] = jnp.concatenate([logits, probs], axis=1).astype(out_ref.dtype)


def _pick_batch_tile(batch: int, preferred: int = 512) -> int:
    """Largest tile <= preferred that divides batch (falls back to full B)."""
    if batch <= preferred:
        return batch
    for tb in (preferred, 256, 128, 64, 32, 16, 8):
        if batch % tb == 0:
            return tb
    # TODO(synk): pad ragged batch sizes to a multiple of 8 instead of a
    # monolithic single-shot block.
    return batch


@functools.partial(jax.jit, static_argnames=("block_b",))
def mlp_forward(snt, weight, bias, *, block_b: int = 512):
    """snt: (B, 4096); weight: (4, 4096) (PyTorch layout); bias: (4,)."""
    B, K = snt.shape
    assert K == IN_FEATURES, f"expected {IN_FEATURES} input features, got {K}"
    assert weight.shape == (OUT_FEATURES, IN_FEATURES)
    b2d = bias.reshape(1, OUT_FEATURES)  # keep 2D for TPU layout

    TB = _pick_batch_tile(B, block_b)
    grid = (B // TB,)
    out_w = 2 * OUT_FEATURES  # merged logits|probs slab

    itemsize = jnp.dtype(snt.dtype).itemsize
    # Double-buffered x + resident weight (x2 buffers) + padded (TB,128) output
    # buffers + 4 MiB compiler slack.  Derived from the working set so it is
    # correct on v5e/v6e (128 MiB physical) and v7x (64 MiB) alike.
    vmem_bytes = (
        2 * TB * IN_FEATURES * itemsize           # x double buffer
        + 2 * OUT_FEATURES * IN_FEATURES * 4      # weight buffers
        + 2 * TB * 128 * itemsize                 # output (lane-padded)
        + (4 << 20)
    )

    cost = pl.CostEstimate(
        flops=2 * B * IN_FEATURES * OUT_FEATURES,
        bytes_accessed=(B * IN_FEATURES * itemsize
                        + OUT_FEATURES * IN_FEATURES * 4
                        + B * out_w * itemsize),
        transcendentals=B * OUT_FEATURES,
    )

    merged = pl.pallas_call(
        mlp_kernel,
        out_shape=jax.ShapeDtypeStruct((B, out_w), snt.dtype),
        grid=grid,
        in_specs=[
            # x: one batch tile per grid step (double-buffered by Pallas).
            pl.BlockSpec((TB, IN_FEATURES), lambda i: (i, 0)),
            # weight: same block index every step => stays resident in VMEM.
            pl.BlockSpec((OUT_FEATURES, IN_FEATURES), lambda i: (0, 0)),
            # bias: tiny, resident.
            pl.BlockSpec((1, OUT_FEATURES), lambda i: (0, 0)),
        ],
        out_specs=pl.BlockSpec((TB, out_w), lambda i: (i, 0)),
        compiler_params=pltpu.CompilerParams(
            # Batch steps are independent: shards across v7x's two
            # TensorCores; harmless no-op on single-core v5e/v6e.
            dimension_semantics=("parallel",),
            vmem_limit_bytes=int(vmem_bytes),
        ),
        cost_estimate=cost,
    )(snt, weight, b2d)

    logits = merged[:, :OUT_FEATURES]
    probs = merged[:, OUT_FEATURES:]
    return [logits, probs]


def init_params(key):
    """Mirror MLP.__init__(init='Normal'): W ~ N(0, 1/sqrt(4096)), b = 0."""
    wkey, _ = jax.random.split(key)
    std = 1.0 / np.sqrt(IN_FEATURES)
    weight = jax.random.normal(wkey, (OUT_FEATURES, IN_FEATURES), jnp.float32) * std
    bias = jnp.zeros((OUT_FEATURES,), jnp.float32)
    return weight, bias


def _reference(snt, weight, bias):
    logits = snt @ weight.T + bias
    return logits, jax.nn.softmax(logits, axis=1)


if __name__ == "__main__":
    key = jax.random.PRNGKey(0)
    pkey, xkey, xkey2 = jax.random.split(key, 3)

    weight, bias = init_params(pkey)

    # Primary check: the module-sized small batch (single-shot path).
    batch = 2
    snt = jax.random.normal(xkey, (batch, IN_FEATURES), jnp.float32)
    logits, probs = mlp_forward(snt, weight, bias)
    jax.block_until_ready(logits)
    jax.block_until_ready(probs)

    ref_logits, ref_probs = _reference(snt, weight, bias)
    np.testing.assert_allclose(np.asarray(logits), np.asarray(ref_logits),
                               rtol=1e-5, atol=1e-5)
    np.testing.assert_allclose(np.asarray(probs), np.asarray(ref_probs),
                               rtol=1e-5, atol=1e-5)

    # Secondary check: exercise the gridded (TB=512, resident-weight) path.
    big_batch = 1024
    snt_big = jax.random.normal(xkey2, (big_batch, IN_FEATURES), jnp.float32)
    logits_b, probs_b = mlp_forward(snt_big, weight, bias)
    jax.block_until_ready(logits_b)
    ref_logits_b, ref_probs_b = _reference(snt_big, weight, bias)
    np.testing.assert_allclose(np.asarray(logits_b), np.asarray(ref_logits_b),
                               rtol=1e-5, atol=1e-5)
    np.testing.assert_allclose(np.asarray(probs_b), np.asarray(ref_probs_b),
                               rtol=1e-5, atol=1e-5)

    print("KERNEL_OK")
</pallas_src>

<mosaic_0001>
module attributes {stable_mosaic.version = 11 : i64} {
  func.func @mlp_kernel(%arg0: i32, %arg1: memref<2x4096xf32, #tpu.memory_space<vmem>>, %arg2: memref<4x4096xf32, #tpu.memory_space<vmem>>, %arg3: memref<1x4xf32, #tpu.memory_space<vmem>>, %arg4: memref<2x8xf32, #tpu.memory_space<vmem>>) attributes {dimension_semantics = [#tpu.dimension_semantics<parallel>], iteration_bounds = array<i64: 1>, scalar_prefetch = 0 : i64, scratch_operands = 0 : i64, tpu.core_type = #tpu.core_type<tc>, window_params = [{transform_indices = @transform_0, window_bounds = array<i64: 2, 4096>}, {pipeline_mode = #tpu.pipeline_mode<synchronous>, transform_indices = @transform_1, window_bounds = array<i64: 4, 4096>}, {pipeline_mode = #tpu.pipeline_mode<synchronous>, transform_indices = @transform_2, window_bounds = array<i64: 1, 4>}, {transform_indices = @transform_3, window_bounds = array<i64: 2, 8>}]} {
    %c0 = arith.constant 0 : index
    %c0_0 = arith.constant 0 : index
    %0 = vector.load %arg1[%c0, %c0_0] : memref<2x4096xf32, #tpu.memory_space<vmem>>, vector<2x4096xf32>
    %c0_1 = arith.constant 0 : index
    %c0_2 = arith.constant 0 : index
    %1 = vector.load %arg2[%c0_1, %c0_2] : memref<4x4096xf32, #tpu.memory_space<vmem>>, vector<4x4096xf32>
    %cst = arith.constant dense<0.000000e+00> : vector<2x4xf32>
    %2 = tpu.matmul %0, %1, %cst {dimension_numbers = #tpu.dot_dimension_numbers<[1], [1], [0], [0], [0, 0, 1, 0], [], []>} : vector<2x4096xf32>, vector<4x4096xf32>, vector<2x4xf32> -> vector<2x4xf32>
    %c0_3 = arith.constant 0 : index
    %c0_4 = arith.constant 0 : index
    %3 = vector.load %arg3[%c0_3, %c0_4] : memref<1x4xf32, #tpu.memory_space<vmem>>, vector<1x4xf32>
    %4 = vector.broadcast %3 : vector<1x4xf32> to vector<2x4xf32>
    %5 = arith.addf %2, %4 : vector<2x4xf32>
    %cst_5 = arith.constant dense<0xFF800000> : vector<2xf32>
    %6 = vector.multi_reduction <maximumf>, %5, %cst_5 [1] : vector<2x4xf32> to vector<2xf32>
    %7 = vector.shape_cast %6 : vector<2xf32> to vector<2x1xf32>
    %8 = vector.broadcast %7 : vector<2x1xf32> to vector<2x4xf32>
    %9 = arith.subf %5, %8 : vector<2x4xf32>
    %10 = math.exp %9 : vector<2x4xf32>
    %cst_6 = arith.constant dense<0.000000e+00> : vector<2xf32>
    %11 = vector.multi_reduction <add>, %10, %cst_6 [1] : vector<2x4xf32> to vector<2xf32>
    %12 = vector.shape_cast %11 : vector<2xf32> to vector<2x1xf32>
    %13 = vector.broadcast %12 : vector<2x1xf32> to vector<2x4xf32>
    %14 = arith.divf %10, %13 : vector<2x4xf32>
    %15 = tpu.concatenate %5, %14 in 1 : vector<2x4xf32>, vector<2x4xf32> -> vector<2x8xf32>
    %c0_7 = arith.constant 0 : index
    %c0_8 = arith.constant 0 : index
    %16 = vector.load %arg4[%c0_7, %c0_8] : memref<2x8xf32, #tpu.memory_space<vmem>>, vector<2x8xf32>
    tpu.vector_store %arg4[%c0_7, %c0_8], %15 {strides = array<i32>} : memref<2x8xf32, #tpu.memory_space<vmem>>, vector<2x8xf32>,
    return
  }
  func.func @transform_0(%arg0: i32) -> (i32, i32) {
    %c0_i32 = arith.constant 0 : i32
    %c0_i32_0 = arith.constant 0 : i32
    return %arg0, %c0_i32 : i32, i32
  }
  func.func @transform_1(%arg0: i32) -> (i32, i32) {
    %c0_i32 = arith.constant 0 : i32
    %c0_i32_0 = arith.constant 0 : i32
    %c0_i32_1 = arith.constant 0 : i32
    return %c0_i32, %c0_i32_0 : i32, i32
  }
  func.func @transform_2(%arg0: i32) -> (i32, i32) {
    %c0_i32 = arith.constant 0 : i32
    %c0_i32_0 = arith.constant 0 : i32
    %c0_i32_1 = arith.constant 0 : i32
    return %c0_i32, %c0_i32_0 : i32, i32
  }
  func.func @transform_3(%arg0: i32) -> (i32, i32) {
    %c0_i32 = arith.constant 0 : i32
    %c0_i32_0 = arith.constant 0 : i32
    return %arg0, %c0_i32 : i32, i32
  }
}

</mosaic_0001>

<bundles_post_ra>
// kernel: mlp_forward.1
= control target key start
LH: loop header
LB: loop body
LE: loop exit
PB: predicated region body
PF: predicated region fallthrough
CT: control target
= control target key end

     0   :  { %8 = vsyncpa [#allocation3], 0  ;;  %s1622_s0 = inlined_call_operand.hbm [shape: f32[2,4096], index: 0, kind: input, shape index: {}]   ;;  %s1623_s1 = inlined_call_operand.hbm [shape: f32[4,4096], index: 1, kind: input, shape index: {}]   ;;  %s1624_s2 = inlined_call_operand.vmem [shape: f32[1,4], index: 2, kind: input, shape index: {}]   ;;  %s1625_s3 = inlined_call_operand.vmem [shape: f32[2,8], index: 3, kind: output, shape index: {}]  }
   0x1   :  { %9 = vsyncpa [#allocation5], 0  ;;  %s1550_s12 = smov [#allocation2]   ;;  %s1551_s14 = smov [#allocation4]  }
   0x2   :  { %s16_s13 = sshll.u32 %s1550_s12, 4  ;;  %s26_s15 = sshll.u32 %s1551_s14, 4  ;;  %s17_s13 = int_to_ptr.vmem [resolvable:$true] %s16_s13  ;;  %s27_s15 = int_to_ptr.vmem [resolvable:$true] %s26_s15 }
   0x3   :  { %s1502_s18 = scalar_lea.hbm %s1622_s0, 1024 }
   0x4   :  { %p1503_p0 = scmp.ne.s32.totalorder %s1622_s0, %s1502_s18  ;;  %p1506_p1 = scmp.lt.u32.totalorder %s1502_s18, %s1622_s0 }
   0x6   :  { %p1508_p2 = pnand %p1506_p1, %p1503_p0 }
   0x8   :  { %1511 = shalt.err (!%p1508_p2)
}
   0x9   :  { %s1512_s23 = scalar_lea.vmem %s17_s13, 1024  ;;  %p1517_p4 = scmp.lt.s32.totalorder %s17_s13, %s17_s13 }
   0xa   :  { %p1513_p3 = scmp.ne.s32.totalorder %s17_s13, %s1512_s23  ;;  %p1518_p5 = scmp.lt.s32.totalorder %s1512_s23, %s1512_s23 }
   0xc   :  { %p1519_p6 = por %p1518_p5, %p1517_p4 }
   0xe   :  { %p1520_p7 = pnand %p1519_p6, %p1513_p3 }
  0x10   :  { %1523 = shalt.err (!%p1520_p7)
}
  0x11   :  { %19 = dma.hbm_to_vmem [thread:$0]  %s1622_s0, 1024, %s17_s13, [#allocation3]  }
  0x12   :  { %s1524_s28 = scalar_lea.hbm %s1623_s1, 2048 }
  0x13   :  { %p1525_p8 = scmp.ne.s32.totalorder %s1623_s1, %s1524_s28  ;;  %p1528_p9 = scmp.lt.u32.totalorder %s1524_s28, %s1623_s1 }
  0x15   :  { %p1530_p10 = pnand %p1528_p9, %p1525_p8 }
  0x17   :  { %1533 = shalt.err (!%p1530_p10)
}
  0x18   :  { %s1534_s6 = scalar_lea.vmem %s27_s15, 2048  ;;  %p1539_p12 = scmp.lt.s32.totalorder %s27_s15, %s27_s15 }
  0x19   :  { %p1535_p11 = scmp.ne.s32.totalorder %s27_s15, %s1534_s6  ;;  %p1540_p13 = scmp.lt.s32.totalorder %s1534_s6, %s1534_s6 }
  0x1b   :  { %p1541_p0 = por %p1540_p13, %p1539_p12 }
  0x1d   :  { %p1542_p1 = pnand %p1541_p0, %p1535_p11 }
  0x1f   :  { %1545 = shalt.err (!%p1542_p1)
}
  0x20   :  { %29 = dma.hbm_to_vmem [thread:$0]  %s1623_s1, 2048, %s27_s15, [#allocation5]  }
  0x21   :  { %1546 = dma.done.wait [#allocation3], 1024  }
  0x22   :  { %1547 = vsyncadd [#allocation3], 4294966272 }
  0x23   :  { %1548 = dma.done.wait [#allocation5], 2048  }
  0x24   :  { %1549 = vsyncadd [#allocation5], 4294965248  ;;  %v81_v0 = vlaneseq  ;;  %v1552_v1 = vmov 1983009808   ;;  %v46_v6 = vld [vmem:[#allocation4] sm:$0xff]  ;;  %v47_v14 = vld [vmem:[#allocation4 + $0x8] sm:$0xff] }
  0x25   :  { %v79_v2 = vunpack.c.l.s4 %v1552_v1  ;;  %v54_v7 = vld [vmem:[#allocation4 + $0x40] sm:$0xff]  ;;  %v261_v9 = vcombine.high %v46_v6, %v46_v6  ;;  %v55_v15 = vld [vmem:[#allocation4 + $0x48] sm:$0xff]  ;;  %v262_v18 = vcombine.high %v47_v14, %v47_v14  ;;  %v48_v22 = vld [vmem:[#allocation4 + $0x10] sm:$0xff]  ;;  %vm1413_vm0 = vcmask 25600  }
  0x26   :  { %v82_v3 = vshrl.u32 %v81_v0, 7  ;;  %v38_v8 = vld [vmem:[#allocation2] sm:$0xff]  ;;  %v269_v10 = vcombine.high %v54_v7, %v54_v7  ;;  %v270_v19 = vcombine.high %v55_v15, %v55_v15  ;;  %v56_v23 = vld [vmem:[#allocation4 + $0x50] sm:$0xff]  ;;  %v263_v28 = vcombine.high %v48_v22, %v48_v22  ;;  %v39_v30 = vld [vmem:[#allocation2 + $0x8] sm:$0xff] }
  0x27   :  { %v80_v4 = vunpack.c.0.s8 %v79_v2  ;;  %v77_v11 = vcombine.high %v38_v8, %v38_v8  ;;  %v42_v13 = vld [vmem:[#allocation2 + $0x20] sm:$0xff]  ;;  %293 = vmatprep.subr.mxu1 %v261_v9  ;;  %v271_v29 = vcombine.high %v56_v23, %v56_v23  ;;  %v43_v31 = vld [vmem:[#allocation2 + $0x28] sm:$0xff]  ;;  %v49_v34 = vld [vmem:[#allocation4 + $0x18] sm:$0xff]  ;;  %v94_v38 = vcombine.high %v39_v30, %v39_v30 }
  0x28   :  { %v145_v16 = vcombine.high %v42_v13, %v42_v13  ;;  %853 = vmatprep.subr.mxu0 %v269_v10  ;;  %294 = vmatpush1.xpose.msra.mxu1 %v46_v6  ;;  %v57_v35 = vld [vmem:[#allocation4 + $0x58] sm:$0xff]  ;;  %v162_v39 = vcombine.high %v43_v31, %v43_v31  ;;  %v264_v40 = vcombine.high %v49_v34, %v49_v34  ;;  %v50_v44 = vld [vmem:[#allocation4 + $0x20] sm:$0xff]  ;;  %v40_v50 = vld [vmem:[#allocation2 + $0x10] sm:$0xff]  ;;  %vm1429_vm1 = vcmask 31744  }
  0x29   :  { %v1598_v5 = vsub.s32 %v80_v4, %v82_v3  ;;  %854 = vmatpush1.xpose.msra.mxu0 %v54_v7  ;;  %363 = vmatprep.subr.mxu1 %v262_v18  ;;  %v272_v41 = vcombine.high %v57_v35, %v57_v35  ;;  %v58_v45 = vld [vmem:[#allocation4 + $0x60] sm:$0xff]  ;;  %v265_v48 = vcombine.high %v50_v44, %v50_v44  ;;  %v44_v51 = vld [vmem:[#allocation2 + $0x30] sm:$0xff]  ;;  %v51_v54 = vld [vmem:[#allocation4 + $0x28] sm:$0xff]  ;;  %vm1431_vm2 = vcmask 58368  }
  0x2a   :  { %923 = vmatprep.subr.mxu0 %v270_v19  ;;  %v273_v49 = vcombine.high %v58_v45, %v58_v45  ;;  %v59_v55 = vld [vmem:[#allocation4 + $0x68] sm:$0xff]  ;;  %v111_v58 = vcombine.high %v40_v50, %v40_v50  ;;  %v179_v59 = vcombine.high %v44_v51, %v44_v51  ;;  %v266_v60 = vcombine.high %v51_v54, %v51_v54  ;;  %v52_v0 = vld [vmem:[#allocation4 + $0x30] sm:$0xff]  ;;  %v41_v7 = vld [vmem:[#allocation2 + $0x18] sm:$0xff] }
  0x2b   :  { %v84_v12 = vrot.slane %v38_v8, %v1598_v5  ;;  %v152_v17 = vrot.slane %v42_v13, %v1598_v5  ;;  %v91_v21 = vrot.slane %v77_v11, %v1598_v5  ;;  %v159_v25 = vrot.slane %v145_v16, %v1598_v5  ;;  %v60_v1 = vld [vmem:[#allocation4 + $0x70] sm:$0xff]  ;;  %v45_v8 = vld [vmem:[#allocation2 + $0x38] sm:$0xff] }
  0x2c   :  { %v101_v32 = vrot.slane %v39_v30, %v1598_v5  ;;  %v169_v33 = vrot.slane %v43_v31, %v1598_v5  ;;  %v108_v42 = vrot.slane %v94_v38, %v1598_v5  ;;  %v176_v43 = vrot.slane %v162_v39, %v1598_v5  ;;  %v53_v11 = vld [vmem:[#allocation4 + $0x38] sm:$0xff] }
  0x2d   :  { %v92_v20 = vcombine.high %v84_v12, %v84_v12  ;;  %v160_v24 = vcombine.high %v152_v17, %v152_v17  ;;  %v93_v26 = vcombine.high %v91_v21, %v91_v21  ;;  %v161_v27 = vcombine.high %v159_v25, %v159_v25 }
  0x2e   :  { %v109_v36 = vcombine.high %v101_v32, %v101_v32  ;;  %v177_v37 = vcombine.high %v169_v33, %v169_v33  ;;  %v110_v46 = vcombine.high %v108_v42, %v108_v42  ;;  %v178_v47 = vcombine.high %v176_v43, %v176_v43 }
  0x2f   :  { %357 = vmatprep.mubr.f32.mxu1 %v92_v20  ;;  %917 = vmatprep.mubr.f32.mxu0 %v160_v24  ;;  %v118_v52 = vrot.slane %v40_v50, %v1598_v5  ;;  %v186_v53 = vrot.slane %v44_v51, %v1598_v5  ;;  %v274_v61 = vcombine.high %v59_v55, %v59_v55 }
  0x30   :  { %358 = vmatmul.mubr.f32.vlgmr.msra.gmra.mrb[0].mxu1 %v84_v12  ;;  %918 = vmatmul.mubr.f32.vlgmr.msra.gmra.mrb[0].mxu0 %v152_v17  ;;  %v125_v62 = vrot.slane %v111_v58, %v1598_v5  ;;  %v193_v63 = vrot.slane %v179_v59, %v1598_v5  ;;  %v267_v4 = vcombine.high %v52_v0, %v52_v0  ;;  %v61_v12 = vld [vmem:[#allocation4 + $0x78] sm:$0xff] }
  0x31   :  { %364 = vmatpush1.xpose.msra.mxu1 %v47_v14  ;;  %924 = vmatpush1.xpose.msra.mxu0 %v55_v15  ;;  %v126_v56 = vcombine.high %v118_v52, %v118_v52  ;;  %v194_v57 = vcombine.high %v186_v53, %v186_v53  ;;  %v275_v6 = vcombine.high %v60_v1, %v60_v1 }
  0x32   :  { %427 = vmatprep.mubr.f32.mxu1 %v93_v26  ;;  %987 = vmatprep.mubr.f32.mxu0 %v161_v27  ;;  %v127_v2 = vcombine.high %v125_v62, %v125_v62  ;;  %v195_v3 = vcombine.high %v193_v63, %v193_v63  ;;  %v135_v9 = vrot.slane %v41_v7, %v1598_v5 }
  0x33   :  { %433 = vmatprep.subr.mxu1 %v263_v28  ;;  %993 = vmatprep.subr.mxu0 %v271_v29  ;;  %v203_v10 = vrot.slane %v45_v8, %v1598_v5  ;;  %v128_v15 = vcombine.high %v41_v7, %v41_v7  ;;  %v196_v16 = vcombine.high %v45_v8, %v45_v8 }
  0x34   :  { %v143_v13 = vcombine.high %v135_v9, %v135_v9  ;;  %v268_v17 = vcombine.high %v53_v11, %v53_v11  ;;  %v276_v18 = vcombine.high %v61_v12, %v61_v12 }
  0x35   :  { %v211_v14 = vcombine.high %v203_v10, %v203_v10  ;;  %v142_v19 = vrot.slane %v128_v15, %v1598_v5  ;;  %v210_v20 = vrot.slane %v196_v16, %v1598_v5 }
  0x38   :  { %428 = vmatmul.mubr.f32.vlgmr.msra.gmra.mrb[0].mxu1 %v91_v21  ;;  %988 = vmatmul.mubr.f32.vlgmr.msra.gmra.mrb[0].mxu0 %v159_v25  ;;  %v144_v21 = vcombine.high %v142_v19, %v142_v19 }
  0x39   :  { %434 = vmatpush1.xpose.msra.mxu1 %v48_v22  ;;  %994 = vmatpush1.xpose.msra.mxu0 %v56_v23  ;;  %v212_v22 = vcombine.high %v210_v20, %v210_v20  ;;  %v1439_v23 = vld [vmem:[%s1624_s2] ss:$0 sm:$0xff]  ;;  %s1553_s2 = smov 4  }
  0x3a   :  { %497 = vmatprep.mubr.f32.mxu1 %v109_v36  ;;  %1057 = vmatprep.mubr.f32.mxu0 %v177_v37 }
  0x3b   :  { %503 = vmatprep.subr.mxu1 %v264_v40  ;;  %1063 = vmatprep.subr.mxu0 %v272_v41 }
  0x40   :  { %498 = vmatmul.mubr.f32.vlgmr.msra.gmra.mrb[0].mxu1 %v101_v32  ;;  %1058 = vmatmul.mubr.f32.vlgmr.msra.gmra.mrb[0].mxu0 %v169_v33 }
  0x41   :  { %504 = vmatpush1.xpose.msra.mxu1 %v49_v34  ;;  %1064 = vmatpush1.xpose.msra.mxu0 %v57_v35 }
  0x42   :  { %567 = vmatprep.mubr.f32.mxu1 %v110_v46  ;;  %1127 = vmatprep.mubr.f32.mxu0 %v178_v47 }
  0x43   :  { %573 = vmatprep.subr.mxu1 %v265_v48  ;;  %1133 = vmatprep.subr.mxu0 %v273_v49 }
  0x48   :  { %568 = vmatmul.mubr.f32.vlgmr.msra.gmra.mrb[0].mxu1 %v108_v42  ;;  %1128 = vmatmul.mubr.f32.vlgmr.msra.gmra.mrb[0].mxu0 %v176_v43 }
  0x49   :  { %574 = vmatpush1.xpose.msra.mxu1 %v50_v44  ;;  %1134 = vmatpush1.xpose.msra.mxu0 %v58_v45 }
  0x4a   :  { %637 = vmatprep.mubr.f32.mxu1 %v126_v56  ;;  %1197 = vmatprep.mubr.f32.mxu0 %v194_v57 }
  0x4b   :  { %643 = vmatprep.subr.mxu1 %v266_v60  ;;  %1203 = vmatprep.subr.mxu0 %v274_v61 }
  0x50   :  { %638 = vmatmul.mubr.f32.vlgmr.msra.gmra.mrb[0].mxu1 %v118_v52  ;;  %1198 = vmatmul.mubr.f32.vlgmr.msra.gmra.mrb[0].mxu0 %v186_v53 }
  0x51   :  { %644 = vmatpush1.xpose.msra.mxu1 %v51_v54  ;;  %1204 = vmatpush1.xpose.msra.mxu0 %v59_v55 }
  0x52   :  { %707 = vmatprep.mubr.f32.mxu1 %v127_v2  ;;  %1267 = vmatprep.mubr.f32.mxu0 %v195_v3 }
  0x53   :  { %713 = vmatprep.subr.mxu1 %v267_v4  ;;  %1273 = vmatprep.subr.mxu0 %v275_v6 }
  0x58   :  { %708 = vmatmul.mubr.f32.vlgmr.msra.gmra.mrb[0].mxu1 %v125_v62  ;;  %1268 = vmatmul.mubr.f32.vlgmr.msra.gmra.mrb[0].mxu0 %v193_v63 }
  0x59   :  { %714 = vmatpush1.xpose.msra.mxu1 %v52_v0  ;;  %1274 = vmatpush1.xpose.msra.mxu0 %v60_v1 }
  0x5a   :  { %777 = vmatprep.mubr.f32.mxu1 %v143_v13  ;;  %1337 = vmatprep.mubr.f32.mxu0 %v211_v14 }
  0x5b   :  { %783 = vmatprep.subr.mxu1 %v268_v17  ;;  %1343 = vmatprep.subr.mxu0 %v276_v18 }
  0x60   :  { %778 = vmatmul.mubr.f32.vlgmr.msra.gmra.mrb[0].mxu1 %v135_v9  ;;  %1338 = vmatmul.mubr.f32.vlgmr.msra.gmra.mrb[0].mxu0 %v203_v10 }
  0x61   :  { %784 = vmatpush1.xpose.msra.mxu1 %v53_v11  ;;  %1344 = vmatpush1.xpose.msra.mxu0 %v61_v12 }
  0x62   :  { %847 = vmatprep.mubr.f32.mxu1 %v144_v21  ;;  %1407 = vmatprep.mubr.f32.mxu0 %v212_v22 }
  0x68   :  { %848 = vmatmul.mubr.f32.vlgmr.msra.gmra.mrb[0].mxu1 %v142_v19  ;;  %1408 = vmatmul.mubr.f32.vlgmr.msra.gmra.mrb[0].mxu0 %v210_v20 }
 0x13b   :  { %v849_v24 = vpop.f32.mrb[0].mxu1  ;;  %v1409_v25 = vpop.f32.mrb[0].mxu0 }
 0x13c   :  { %v1440_v26 = vadd.f32 %v1439_v23, %v849_v24  ;;  %v851_v5 = vpop.f32.mrb[1].mxu1  ;;  %v1411_v27 = vpop.f32.mrb[1].mxu0 }
 0x13e   :  { %v1441_v28 = vadd.f32 %v1440_v26, %v1409_v25 }
 0x140   :  { %v1414_v29 = vsel %vm1413_vm0, %v1441_v28, -inf }
 0x141   :  { %1415 = vmax.xlane.f32.xlu0 %v1414_v29 }
 0x1ce   :  { %v1416_v30 = vpop.xlane.xlu0 %1415 }
 0x1cf   :  { %v1417_v31 = vsub.f32 %v1441_v28, %v1416_v30 }
 0x1d1   :  { %v1418_v32 = vmul.f32 1.442695, %v1417_v31 }
 0x1d3   :  { %1498 = vpow2.f32 %v1418_v32 }
 0x1dd   :  { %v1499_v33 = vpop.eup %1498 }
 0x1de   :  { %v1420_v34 = vsel %vm1413_vm0, %v1499_v33, 0.0 }
 0x1df   :  { %1421 = vadd.xlane.f32.xlu0 %v1420_v34 }
 0x26c   :  { %v1422_v35 = vpop.xlane.xlu0 %1421 }
 0x26d   :  { %1500 = vrcp.f32 %v1422_v35 }
 0x277   :  { %v1501_v36 = vpop.eup %1500 }
 0x278   :  { %v1424_v37 = vmul.f32 %v1501_v36, %v1499_v33 }
 0x27a   :  { %1426 = vrot.lane.b32.xlu1 %v1424_v37, %s1553_s2 }
 0x2ec   :  { %v1427_v38 = vpop.permute.xlu1 %1426 }
 0x2ed   :  { %v1430_v39 = vsel %vm1429_vm1, %v1441_v28, %v1427_v38 }
 0x2ee   :  { %1432 = vst.msk [vmem:[%s1625_s3] sm:$0x3] %vm1431_vm2, %v1430_v39 }
 0x2ef   :  { %1437 = vsyncpa [#allocation3], 1 }
 0x2f0   :  { %1438 = vsyncpa [#allocation5], 1 }

</bundles_post_ra>
